<compile_context>
chip_gen: v7x
topology: tpu7x:2x2x1
jax: 0.10.0
libtpu: 0.0.40
codegen_flags: <defaults>
</compile_context>

<pallas_src>
import functools

import jax
import jax.numpy as jnp
from jax.experimental import pallas as pl
from jax.experimental.pallas import tpu as pltpu

LEAKY_SLOPE = 0.01   # nn.LeakyReLU default negative_slope
BN_EPS = 1e-5        # nn.BatchNorm1d default eps


def _hidden_block(h, w, b, gamma, beta):
    # Linear
    h = jnp.dot(h, w, preferred_element_type=jnp.float32) + b
    # LeakyReLU: max(h, slope*h) is exact for slope in (0, 1)
    h = jnp.maximum(h, LEAKY_SLOPE * h)
    # BatchNorm1d (training-mode batch statistics, biased variance),
    # scale folded into a (1, F) vector before the broadcast multiply.
    mean = jnp.mean(h, axis=0, keepdims=True)
    var = jnp.mean((h - mean) ** 2, axis=0, keepdims=True)
    scale = jax.lax.rsqrt(var + BN_EPS) * gamma
    return (h - mean) * scale + beta


def _mlp_kernel(x_ref, p_ref, out_ref, *, in_f, hid):
    h = x_ref[0].astype(jnp.float32)     # (B, IN)   -- one batch-group
    p = p_ref[...]                       # (IN + 2*HID + 7, HID) packed params

    w1 = p[0:in_f, :]                              # (IN,  HID)
    w2 = p[in_f:in_f + hid, :]                     # (HID, HID)
    wo = p[in_f + hid:in_f + 2 * hid, :]           # (HID, HID), zero-padded past OUT
    voff = in_f + 2 * hid                          # sublane-aligned (80) for defaults
    b1, g1, be1 = p[voff + 0:voff + 1, :], p[voff + 1:voff + 2, :], p[voff + 2:voff + 3, :]
    b2, g2, be2 = p[voff + 3:voff + 4, :], p[voff + 4:voff + 5, :], p[voff + 5:voff + 6, :]
    bo = p[voff + 6:voff + 7, :]                   # zero-padded past OUT

    h = _hidden_block(h, w1, b1, g1, be1)
    h = _hidden_block(h, w2, b2, g2, be2)
    out = jnp.dot(h, wo, preferred_element_type=jnp.float32) + bo
    # Lane-dense store: full (B, HID) slab; the wrapper slices [:, :OUT].
    out_ref[0] = out.astype(out_ref.dtype)


def pack_params(params, in_features, hid, out_features):
    """Pack the 10 parameter arrays into ONE slab (2 input DMAs total with x)."""
    (w1, b1, g1, be1, w2, b2, g2, be2, wo, bo) = params
    assert out_features <= hid, "packing scheme assumes out_features <= hidden"
    wo_p = jnp.zeros((hid, hid), jnp.float32).at[:, :out_features].set(wo)
    bo_p = jnp.zeros((1, hid), jnp.float32).at[:, :out_features].set(bo)
    # rows: [w1 (IN) | w2 (HID) | wo (HID) | b1 g1 be1 b2 g2 be2 bo (7)]
    return jnp.concatenate(
        [w1, w2, wo_p, b1, g1, be1, b2, g2, be2, bo_p], axis=0)


def simple_mlp_batched(x, p_packed, *, in_features, hid, out_features):
    """x: [G, B, in_features] float32 — G independent batches (each gets its own
    BatchNorm statistics, exactly like G separate forward() calls)."""
    G, B, IN = x.shape
    assert IN == in_features
    kernel = functools.partial(_mlp_kernel, in_f=in_features, hid=hid)

    in_specs = [
        pl.BlockSpec((1, B, IN), lambda g: (g, 0, 0)),          # per-step batch
        pl.BlockSpec(p_packed.shape, lambda g: (0, 0)),         # VMEM-resident params
    ]
    out_spec = pl.BlockSpec((1, B, hid), lambda g: (g, 0, 0))   # lane-dense padded out

    out_padded = pl.pallas_call(
        kernel,
        out_shape=jax.ShapeDtypeStruct((G, B, hid), jnp.float32),
        grid=(G,),
        in_specs=in_specs,
        out_specs=out_spec,
        compiler_params=pltpu.CompilerParams(
            # "parallel": independent steps -> shard across v7x's 2 TensorCores.
            dimension_semantics=("parallel",)),
    )(x, p_packed)
    # Free wrapper-side slice instead of a 4-lane masked store in the kernel.
    return out_padded[..., :out_features]


def simple_mlp(x, p_packed, *, in_features, hid, out_features):
    """Single batch x: [B, in_features] — matches one PyTorch forward() call."""
    return simple_mlp_batched(x[None], p_packed, in_features=in_features,
                              hid=hid, out_features=out_features)[0]


def init_params(key, in_features, intermediate_size, out_features):
    """Deterministic synthetic weights (shapes match torchtuples MLPVanilla
    with num_hidden_layers=2, batch_norm=True, bias=True). Linear weights are
    stored transposed vs PyTorch, i.e. [in, out]."""
    ks = jax.random.split(key, 6)

    def lin(k, fin, fout):
        kw, kb = jax.random.split(k)
        w = jax.random.normal(kw, (fin, fout), jnp.float32) * 0.1
        b = jax.random.normal(kb, (1, fout), jnp.float32) * 0.1
        return w, b

    w1, b1 = lin(ks[0], in_features, intermediate_size)
    g1 = jnp.ones((1, intermediate_size), jnp.float32)    # BN gamma init
    be1 = jnp.zeros((1, intermediate_size), jnp.float32)  # BN beta init
    w2, b2 = lin(ks[1], intermediate_size, intermediate_size)
    g2 = jnp.ones((1, intermediate_size), jnp.float32)
    be2 = jnp.zeros((1, intermediate_size), jnp.float32)
    wo, bo = lin(ks[2], intermediate_size, out_features)
    return (w1, b1, g1, be1, w2, b2, g2, be2, wo, bo)


def simple_mlp_ref(x, params):
    """Pure-JAX reference with identical math (for correctness check)."""
    (w1, b1, g1, be1, w2, b2, g2, be2, wo, bo) = params
    h = x
    for (w, b, g, be) in ((w1, b1, g1, be1), (w2, b2, g2, be2)):
        h = h @ w + b
        h = jnp.where(h >= 0, h, LEAKY_SLOPE * h)
        m = jnp.mean(h, axis=0, keepdims=True)
        v = jnp.mean((h - m) ** 2, axis=0, keepdims=True)
        h = (h - m) / jnp.sqrt(v + BN_EPS) * g + be
    return h @ wo + bo


if __name__ == "__main__":
    # SimpleMLP(in_features=16, intermediate_size=32, num_hidden_layers=2,
    #           out_features=4, batch_norm=True, dropout=None, bias=True)
    B, IN, HID, OUT = 8, 16, 32, 4
    G = 4  # number of independent batches amortized over one launch

    key = jax.random.PRNGKey(0)
    kx, kp = jax.random.split(key)
    x = jax.random.normal(kx, (G, B, IN), jnp.float32)
    params = init_params(kp, IN, HID, OUT)
    p_packed = pack_params(params, IN, HID, OUT)

    # Batched (launch-amortized) path: G independent forward() calls in one kernel.
    out = simple_mlp_batched(x, p_packed, in_features=IN, hid=HID,
                             out_features=OUT)
    out = jax.block_until_ready(out)
    ref = jnp.stack([simple_mlp_ref(x[g], params) for g in range(G)])
    assert out.shape == (G, B, OUT)
    assert jnp.allclose(out, ref, atol=1e-4, rtol=1e-4)

    # Single-batch path (exactly one PyTorch forward() call).
    out1 = simple_mlp(x[0], p_packed, in_features=IN, hid=HID, out_features=OUT)
    out1 = jax.block_until_ready(out1)
    assert out1.shape == (B, OUT)
    assert jnp.allclose(out1, simple_mlp_ref(x[0], params), atol=1e-4, rtol=1e-4)

    print("KERNEL_OK")
</pallas_src>

<mosaic_0001>
module attributes {stable_mosaic.version = 11 : i64} {
  func.func @_mlp_kernel(%arg0: i32, %arg1: memref<1x8x16xf32, #tpu.memory_space<vmem>>, %arg2: memref<87x32xf32, #tpu.memory_space<vmem>>, %arg3: memref<1x8x32xf32, #tpu.memory_space<vmem>>) attributes {dimension_semantics = [#tpu.dimension_semantics<parallel>], iteration_bounds = array<i64: 4>, scalar_prefetch = 0 : i64, scratch_operands = 0 : i64, tpu.core_type = #tpu.core_type<tc>, window_params = [{transform_indices = @transform_0, window_bounds = array<i64: 1, 8, 16>}, {pipeline_mode = #tpu.pipeline_mode<synchronous>, transform_indices = @transform_1, window_bounds = array<i64: 87, 32>}, {transform_indices = @transform_2, window_bounds = array<i64: 1, 8, 32>}]} {
    %c0 = arith.constant 0 : index
    %c0_0 = arith.constant 0 : index
    %c0_1 = arith.constant 0 : index
    %0 = vector.load %arg1[%c0, %c0_0, %c0_1] : memref<1x8x16xf32, #tpu.memory_space<vmem>>, vector<1x8x16xf32>
    %1 = vector.shape_cast %0 : vector<1x8x16xf32> to vector<8x16xf32>
    %c0_2 = arith.constant 0 : index
    %c0_3 = arith.constant 0 : index
    %2 = vector.load %arg2[%c0_2, %c0_3] : memref<87x32xf32, #tpu.memory_space<vmem>>, vector<87x32xf32>
    %3 = vector.extract_strided_slice %2 {offsets = [0, 0], sizes = [16, 32], strides = [1, 1]} : vector<87x32xf32> to vector<16x32xf32>
    %4 = vector.extract_strided_slice %2 {offsets = [16, 0], sizes = [32, 32], strides = [1, 1]} : vector<87x32xf32> to vector<32x32xf32>
    %5 = vector.extract_strided_slice %2 {offsets = [48, 0], sizes = [32, 32], strides = [1, 1]} : vector<87x32xf32> to vector<32x32xf32>
    %6 = vector.extract_strided_slice %2 {offsets = [80, 0], sizes = [1, 32], strides = [1, 1]} : vector<87x32xf32> to vector<1x32xf32>
    %7 = vector.extract_strided_slice %2 {offsets = [81, 0], sizes = [1, 32], strides = [1, 1]} : vector<87x32xf32> to vector<1x32xf32>
    %8 = vector.extract_strided_slice %2 {offsets = [82, 0], sizes = [1, 32], strides = [1, 1]} : vector<87x32xf32> to vector<1x32xf32>
    %9 = vector.extract_strided_slice %2 {offsets = [83, 0], sizes = [1, 32], strides = [1, 1]} : vector<87x32xf32> to vector<1x32xf32>
    %10 = vector.extract_strided_slice %2 {offsets = [84, 0], sizes = [1, 32], strides = [1, 1]} : vector<87x32xf32> to vector<1x32xf32>
    %11 = vector.extract_strided_slice %2 {offsets = [85, 0], sizes = [1, 32], strides = [1, 1]} : vector<87x32xf32> to vector<1x32xf32>
    %12 = vector.extract_strided_slice %2 {offsets = [86, 0], sizes = [1, 32], strides = [1, 1]} : vector<87x32xf32> to vector<1x32xf32>
    %cst = arith.constant dense<0.000000e+00> : vector<8x32xf32>
    %13 = tpu.matmul %1, %3, %cst {dimension_numbers = #tpu.dot_dimension_numbers<[1], [0], [0], [1], [0, 0, 1, 1], [], []>} : vector<8x16xf32>, vector<16x32xf32>, vector<8x32xf32> -> vector<8x32xf32>
    %14 = vector.broadcast %6 : vector<1x32xf32> to vector<8x32xf32>
    %15 = arith.addf %13, %14 : vector<8x32xf32>
    %cst_4 = arith.constant 0.00999999977 : f32
    %16 = vector.broadcast %cst_4 : f32 to vector<8x32xf32>
    %17 = arith.mulf %16, %15 : vector<8x32xf32>
    %18 = arith.maximumf %15, %17 : vector<8x32xf32>
    %cst_5 = arith.constant dense<0.000000e+00> : vector<32xf32>
    %19 = vector.multi_reduction <add>, %18, %cst_5 [0] : vector<8x32xf32> to vector<32xf32>
    %20 = vector.shape_cast %19 : vector<32xf32> to vector<1x32xf32>
    %cst_6 = arith.constant 8.000000e+00 : f32
    %21 = vector.broadcast %cst_6 : f32 to vector<1x32xf32>
    %22 = arith.divf %20, %21 : vector<1x32xf32>
    %23 = vector.broadcast %22 : vector<1x32xf32> to vector<8x32xf32>
    %24 = arith.subf %18, %23 : vector<8x32xf32>
    %25 = arith.mulf %24, %24 : vector<8x32xf32>
    %cst_7 = arith.constant dense<0.000000e+00> : vector<32xf32>
    %26 = vector.multi_reduction <add>, %25, %cst_7 [0] : vector<8x32xf32> to vector<32xf32>
    %27 = vector.shape_cast %26 : vector<32xf32> to vector<1x32xf32>
    %cst_8 = arith.constant 8.000000e+00 : f32
    %28 = vector.broadcast %cst_8 : f32 to vector<1x32xf32>
    %29 = arith.divf %27, %28 : vector<1x32xf32>
    %cst_9 = arith.constant 9.99999974E-6 : f32
    %30 = vector.broadcast %cst_9 : f32 to vector<1x32xf32>
    %31 = arith.addf %29, %30 : vector<1x32xf32>
    %32 = math.rsqrt %31 : vector<1x32xf32>
    %33 = arith.mulf %32, %7 : vector<1x32xf32>
    %34 = vector.broadcast %22 : vector<1x32xf32> to vector<8x32xf32>
    %35 = arith.subf %18, %34 : vector<8x32xf32>
    %36 = vector.broadcast %33 : vector<1x32xf32> to vector<8x32xf32>
    %37 = arith.mulf %35, %36 : vector<8x32xf32>
    %38 = vector.broadcast %8 : vector<1x32xf32> to vector<8x32xf32>
    %39 = arith.addf %37, %38 : vector<8x32xf32>
    %cst_10 = arith.constant dense<0.000000e+00> : vector<8x32xf32>
    %40 = tpu.matmul %39, %4, %cst_10 {dimension_numbers = #tpu.dot_dimension_numbers<[1], [0], [0], [1], [0, 0, 1, 1], [], []>} : vector<8x32xf32>, vector<32x32xf32>, vector<8x32xf32> -> vector<8x32xf32>
    %41 = vector.broadcast %9 : vector<1x32xf32> to vector<8x32xf32>
    %42 = arith.addf %40, %41 : vector<8x32xf32>
    %cst_11 = arith.constant 0.00999999977 : f32
    %43 = vector.broadcast %cst_11 : f32 to vector<8x32xf32>
    %44 = arith.mulf %43, %42 : vector<8x32xf32>
    %45 = arith.maximumf %42, %44 : vector<8x32xf32>
    %cst_12 = arith.constant dense<0.000000e+00> : vector<32xf32>
    %46 = vector.multi_reduction <add>, %45, %cst_12 [0] : vector<8x32xf32> to vector<32xf32>
    %47 = vector.shape_cast %46 : vector<32xf32> to vector<1x32xf32>
    %cst_13 = arith.constant 8.000000e+00 : f32
    %48 = vector.broadcast %cst_13 : f32 to vector<1x32xf32>
    %49 = arith.divf %47, %48 : vector<1x32xf32>
    %50 = vector.broadcast %49 : vector<1x32xf32> to vector<8x32xf32>
    %51 = arith.subf %45, %50 : vector<8x32xf32>
    %52 = arith.mulf %51, %51 : vector<8x32xf32>
    %cst_14 = arith.constant dense<0.000000e+00> : vector<32xf32>
    %53 = vector.multi_reduction <add>, %52, %cst_14 [0] : vector<8x32xf32> to vector<32xf32>
    %54 = vector.shape_cast %53 : vector<32xf32> to vector<1x32xf32>
    %cst_15 = arith.constant 8.000000e+00 : f32
    %55 = vector.broadcast %cst_15 : f32 to vector<1x32xf32>
    %56 = arith.divf %54, %55 : vector<1x32xf32>
    %cst_16 = arith.constant 9.99999974E-6 : f32
    %57 = vector.broadcast %cst_16 : f32 to vector<1x32xf32>
    %58 = arith.addf %56, %57 : vector<1x32xf32>
    %59 = math.rsqrt %58 : vector<1x32xf32>
    %60 = arith.mulf %59, %10 : vector<1x32xf32>
    %61 = vector.broadcast %49 : vector<1x32xf32> to vector<8x32xf32>
    %62 = arith.subf %45, %61 : vector<8x32xf32>
    %63 = vector.broadcast %60 : vector<1x32xf32> to vector<8x32xf32>
    %64 = arith.mulf %62, %63 : vector<8x32xf32>
    %65 = vector.broadcast %11 : vector<1x32xf32> to vector<8x32xf32>
    %66 = arith.addf %64, %65 : vector<8x32xf32>
    %cst_17 = arith.constant dense<0.000000e+00> : vector<8x32xf32>
    %67 = tpu.matmul %66, %5, %cst_17 {dimension_numbers = #tpu.dot_dimension_numbers<[1], [0], [0], [1], [0, 0, 1, 1], [], []>} : vector<8x32xf32>, vector<32x32xf32>, vector<8x32xf32> -> vector<8x32xf32>
    %68 = vector.broadcast %12 : vector<1x32xf32> to vector<8x32xf32>
    %69 = arith.addf %67, %68 : vector<8x32xf32>
    %c0_18 = arith.constant 0 : index
    %c0_19 = arith.constant 0 : index
    %c0_20 = arith.constant 0 : index
    %70 = vector.load %arg3[%c0_18, %c0_19, %c0_20] : memref<1x8x32xf32, #tpu.memory_space<vmem>>, vector<1x8x32xf32>
    %71 = vector.shape_cast %70 : vector<1x8x32xf32> to vector<8x32xf32>
    %72 = vector.shape_cast %69 : vector<8x32xf32> to vector<1x8x32xf32>
    tpu.vector_store %arg3[%c0_18, %c0_19, %c0_20], %72 {strides = array<i32>} : memref<1x8x32xf32, #tpu.memory_space<vmem>>, vector<1x8x32xf32>,
    return
  }
  func.func @transform_0(%arg0: i32) -> (i32, i32, i32) {
    %c0_i32 = arith.constant 0 : i32
    %c0_i32_0 = arith.constant 0 : i32
    %c0_i32_1 = arith.constant 0 : i32
    return %arg0, %c0_i32, %c0_i32_0 : i32, i32, i32
  }
  func.func @transform_1(%arg0: i32) -> (i32, i32) {
    %c0_i32 = arith.constant 0 : i32
    %c0_i32_0 = arith.constant 0 : i32
    %c0_i32_1 = arith.constant 0 : i32
    return %c0_i32, %c0_i32_0 : i32, i32
  }
  func.func @transform_2(%arg0: i32) -> (i32, i32, i32) {
    %c0_i32 = arith.constant 0 : i32
    %c0_i32_0 = arith.constant 0 : i32
    %c0_i32_1 = arith.constant 0 : i32
    return %arg0, %c0_i32, %c0_i32_0 : i32, i32, i32
  }
}

</mosaic_0001>

<bundles_post_ra>
// kernel: tpu_custom_call.1
= control target key start
LH: loop header
LB: loop body
LE: loop exit
PB: predicated region body
PF: predicated region fallthrough
CT: control target
= control target key end

     0   :  { %7 = vsyncpa [#allocation3], 0  ;;  %s887_s0 = inlined_call_operand.vmem [shape: f32[4,8,16], index: 0, kind: input, shape index: {}]   ;;  %s888_s1 = inlined_call_operand.vmem [shape: f32[87,32], index: 1, kind: input, shape index: {}]   ;;  %s889_s2 = inlined_call_operand.hbm [shape: f32[4,8,32], index: 2, kind: output, shape index: {}]  }
   0x1   :  { %9 = vsyncpa [#allocation3 + $0x1], 0  ;;  %s724_s9 = smov 0   ;;  %s726_s10 = smov 0  }
   0x2   :  { %s728_s11 = smov 0   ;;  %s730_s12 = smov 0  }
   0x3 LB: > { %s745_s13 = sadd.s32 4294967295, %s703_s12   ;;  %s525_s14 = sadd.s32 4294967294, %s703_s12   ;;  %s703_s12 = sphi %s730_s12, %s895_s12   ;;  %s699_s11 = sphi %s728_s11, %s894_s11   ;;  %s695_s10 = sphi %s726_s10, %s893_s10   ;;  %s691_s9 = sphi %s724_s9, %s892_s9  }
   0x4   : > { %s749_s15 = sadd.s32 1, %s703_s12   ;;  %s69_s16 = sadd.s32 1, %s699_s11 }
   0x5   : > { %s66_s17 = ssub.s32 %s703_s12, %s749_s15  ;;  %p79_p0 = scmp.ne.s32.totalorder %s699_s11, %s695_s10 }
   0x6   : > { %p67_p1 = scmp.eq.s32.totalorder %s66_s17, 0  ;;  %p80_p2 = scmp.eq.s32.totalorder %s745_s13, 3 }
   0x7   : > { %p85_p3 = scmp.ne.s32.totalorder %s695_s10, %s691_s9  ;;  %p86_p4 = scmp.eq.s32.totalorder %s525_s14, 3 }
   0x8   : > { %s760_s18 = scalar_select %p67_p1, %s699_s11, %s69_s16  }
   0x9   : > { %p762_p5 = por %p80_p2, %p79_p0  ;;  %p766_p6 = por %p86_p4, %p85_p3 }
   0xa   : > { %p528_p7 = scmp.ge.s32.totalorder %s703_s12, 1  ;;  %p114_p8 = scmp.lt.s32.totalorder %s703_s12, 5 }
   0xc   : > { %p115_p9 = pnand %p528_p7, %p114_p8 }
   0xd   : > { %v140_v0 = vld [vmem:[%s888_s1] sm:$0xff] (!%p115_p9)  ;;  %v141_v1 = vld [vmem:[%s888_s1 + $0x8] sm:$0xff] (!%p115_p9)  ;;  %p135_p10 = scmp.lt.s32.totalorder (!%p115_p9), %s745_s13, 3  ;;  %v705_v2 = vmov (!%p115_p9), 0.0|0.0   ;;  %vm706_vm0 = vmmov (!%p115_p9), 0   ;;  %v707_v4 = vmov (!%p115_p9), 0.0   ;;  %v151_v12 = vlaneseq (!%p115_p9) }
   0xe   : > { %118 = sbr.rel (%p115_p9) target bundleno = 800 (0x320), region = 28  ;;  %580 = vmatprep.subr.bf16.mxu0 (!%p115_p9), %v705_v2  ;;  %v581_v3 = vpack.c.bf16 (!%p115_p9), %v141_v1, %v140_v0  ;;  %555 = vmatprep.mubr.msk.f32.mxu0 (!%p115_p9), %vm706_vm0, %v707_v4  ;;  %vm155_vm1 = vcmask (!%p115_p9), 130048   ;;  %v142_v6 = vld [vmem:[%s888_s1 + $0x10] sm:$0xff] (!%p115_p9)  ;;  %v143_v7 = vld [vmem:[%s888_s1 + $0x18] sm:$0xff] (!%p115_p9)  ;;  %v144_v9 = vld [vmem:[%s888_s1 + $0x20] sm:$0xff] (!%p115_p9)  ;;  %vm231_vm2 = vcmask (!%p115_p9), 261120  }
   0xf   : > { %583 = vmatprep.subr.bf16.mxu1 (!%p115_p9), %v705_v2  ;;  %566 = vmatprep.mubr.msk.f32.mxu1 (!%p115_p9), %vm706_vm0, %v707_v4  ;;  %v584_v8 = vpack.c.bf16 (!%p115_p9), %v143_v7, %v142_v6  ;;  %v145_v10 = vld [vmem:[%s888_s1 + $0x28] sm:$0xff] (!%p115_p9)  ;;  %v799_v13 = vshrl.u32 (!%p115_p9), %v151_v12, 7  ;;  %v805_v15 = vld [vmem:[%s888_s1 + $0x50] sm:$0x7f] (!%p115_p9)  ;;  %v147_v50 = vld [vmem:[%s888_s1 + $0x38] sm:$0xff] (!%p115_p9)  ;;  %s535_s3 = sshll.u32 (!%p115_p9), %s745_s13, 7 }
  0x10   : > { %582 = vmatpush3.bf16.msra.mxu0 (!%p115_p9), %v581_v3  ;;  %v587_v11 = vpack.c.bf16 (!%p115_p9), %v145_v10, %v144_v9  ;;  %v146_v49 = vld [vmem:[%s888_s1 + $0x30] sm:$0xff] (!%p115_p9)  ;;  %v148_v52 = vld [vmem:[%s888_s1 + $0x40] sm:$0xff] (!%p115_p9)  ;;  %v149_v53 = vld [vmem:[%s888_s1 + $0x48] sm:$0xff] (!%p115_p9)  ;;  %s844_s8 = scalar_lea.hbm (!%p115_p9), %s889_s2, %s535_s3 }
  0x11   : > { %589 = vmatprep.subr.bf16.mxu0 (!%p115_p9), %v705_v2  ;;  %585 = vmatpush3.bf16.msra.mxu1 (!%p115_p9), %v584_v8  ;;  %v153_v14 = vsub.s32 (!%p115_p9), 0, %v799_v13  ;;  %v256_v41 = vsub.s32 (!%p115_p9), 1, %v799_v13  ;;  %v261_v42 = vsub.s32 (!%p115_p9), 2, %v799_v13  ;;  %v590_v51 = vpack.c.bf16 (!%p115_p9), %v147_v50, %v146_v49 }
  0x12   : > { %586 = vmatprep.subr.bf16.mxu1 (!%p115_p9), %v705_v2  ;;  %v593_v54 = vpack.c.bf16 (!%p115_p9), %v149_v53, %v148_v52  ;;  %v266_v55 = vsub.s32 (!%p115_p9), 3, %v799_v13 }
  0x13   : > { %v154_v16 = vrot.slane (!%p115_p9), %v805_v15, %v153_v14  ;;  %v262_v46 = vrot.slane (!%p115_p9), %v805_v15, %v261_v42 }
  0x14   : > { %v267_v56 = vrot.slane (!%p115_p9), %v805_v15, %v266_v55 }
  0x15   : > { %s136_s25 = scalar_select %p135_p10, %s745_s13, 3  ;;  %588 = vmatpush3.bf16.msra.mxu1 %v587_v11 }
  0x16   : > { %s708_s13 = smov [#allocation2]  }
  0x17   : > { %s530_s26 = sshll.u32 %s136_s25, 3  ;;  %s645_s17 = sshll.u32 %s708_s13, 4  ;;  %s646_s17 = int_to_ptr.vmem [resolvable:$false] %s645_s17 }
  0x18   : > { %s138_s29 = scalar_lea.vmem %s887_s0, %s530_s26  ;;  %s647_s21 = scalar_lea.vmem %s646_s17, 256 }
  0x19   : > { %v139_v5 = vld [vmem:[%s138_s29] sm:$0xff]  ;;  %s132_s29 = sand.u32 1, %s695_s10  }
  0x1a   : > { %556 = vmatmul.mubr.msk.f32.vlgmr.msra.gmra.mrb[0].mxu0 %vm155_vm1, %v139_v5  ;;  %s529_s30 = sshll.u32 %s132_s29, 3  ;;  %s453_s14 = scalar_lea.sflag [#allocation3], %s132_s29 }
  0x1b   : > { %577 = vmatprep.mubr.msk.f32.mxu0 %vm706_vm0, %v707_v4  ;;  %591 = vmatpush3.bf16.msra.mxu0 %v590_v51  ;;  %s134_s4 = scalar_lea.vmem [#allocation2], %s529_s30 }
  0x1c   : > { %592 = vmatprep.subr.bf16.mxu0 %v705_v2  ;;  %s466_s5 = sshll.u32 %s134_s4, 4  ;;  %s846_s5 = int_to_ptr.vmem [resolvable:$true] %s466_s5 }
  0x1d   : > { %s641_s16 = scalar_lea.vmem %s846_s5, 128  ;;  %p648_p0 = scmp.lt.s32.totalorder %s846_s5, %s646_s17 }
  0x1e   : > { %p642_p11 = scmp.ne.s32.totalorder %s846_s5, %s641_s16  ;;  %p649_p1 = scmp.lt.s32.totalorder %s647_s21, %s641_s16 }
  0x1f   : > { %594 = vmatpush3.bf16.msra.mxu0 %v593_v54 }
  0x20   : > { %p643_p12 = pnand %p642_p11, %p762_p5  ;;  %p650_p2 = por %p649_p1, %p648_p0 }
  0x22   : > { %p644_p13 = pneg %p643_p12 }
  0x24   : > { %p651_p3 = pnand %p650_p2, %p644_p13 }
  0xed   : > { %v225_v17 = vpop.f32.mrb[0].mxu0 }
  0xee   : > { %v226_v18 = vadd.f32 %v225_v17, %v154_v16  ;;  %v557_v19 = vpop.f32.mrb[1].mxu0 }
  0xef   : > { %v366_v19 = vsub.s32 4, %v799_v13 }
  0xf0   : > { %v229_v20 = vmul.f32 0.01, %v226_v18 }
  0xf2   : > { %v230_v21 = vmax.f32 %v226_v18, %v229_v20  ;;  %v371_v20 = vsub.s32 5, %v799_v13 }
  0xf4   : > { %v232_v22 = vsel %vm231_vm2, %v230_v21, 0.0 }
  0xf5   : > { %v233_v23 = vrot.slane %v232_v22, 4 }
  0xf7   : > { %v234_v24 = vadd.f32 %v233_v23, %v232_v22 }
  0xf9   : > { %v235_v25 = vrot.slane %v234_v24, 2 }
  0xfb   : > { %v236_v26 = vadd.f32 %v235_v25, %v234_v24  ;;  %v372_v24 = vrot.slane %v805_v15, %v371_v20 }
  0xfd   : > { %v237_v27 = vrot.slane %v236_v26, 1 }
  0xff   : > { %v238_v28 = vadd.f32 %v237_v27, %v236_v26  ;;  %v376_v27 = vsub.s32 6, %v799_v13 }
 0x101   : > { %v240_v29 = vmul.f32 0.125, %v238_v28  ;;  %v377_v28 = vrot.slane %v805_v15, %v376_v27 }
 0x103   : > { %v241_v30 = vsub.f32 %v230_v21, %v240_v29 }
 0x105   : > { %v242_v31 = vmul.f32 %v241_v30, %v241_v30 }
 0x107   : > { %v243_v32 = vsel %vm231_vm2, %v242_v31, 0.0 }
 0x108   : > { %v244_v33 = vrot.slane %v243_v32, 4 }
 0x10a   : > { %v245_v34 = vadd.f32 %v244_v33, %v243_v32 }
 0x10c   : > { %v246_v35 = vrot.slane %v245_v34, 2 }
 0x10e   : > { %v247_v36 = vadd.f32 %v246_v35, %v245_v34 }
 0x110   : > { %v248_v37 = vrot.slane %v247_v36, 1 }
 0x112   : > { %v249_v38 = vadd.f32 %v248_v37, %v247_v36 }
 0x114   : > { %v250_v39 = vmul.f32 0.125, %v249_v38 }
 0x116   : > { %v251_v40 = vadd.f32 1e-05, %v250_v39 }
 0x118   : > { %637 = vrsqrt.f32 %v251_v40 }
 0x122   : > { %v638_v43 = vpop.eup %637 }
 0x123   : > { %v253_v44 = vmul.f32 %v638_v43, %v805_v15 }
 0x125   : > { %v257_v45 = vrot.slane %v253_v44, %v256_v41 }
 0x127   : > { %v258_v47 = vmul.f32 %v257_v45, %v241_v30 }
 0x129   : > { %v263_v48 = vadd.f32 %v262_v46, %v258_v47 }
 0x12b   : > { %567 = vmatmul.mubr.msk.f32.vlgmr.msra.gmra.mrb[0].mxu1 %vm231_vm2, %v263_v48 }
 0x1fe   : > { %v337_v57 = vpop.f32.mrb[0].mxu1 }
 0x1ff   : > { %v338_v58 = vadd.f32 %v337_v57, %v267_v56  ;;  %v568_v59 = vpop.f32.mrb[1].mxu1 }
 0x201   : > { %v341_v60 = vmul.f32 0.01, %v338_v58 }
 0x203   : > { %v342_v61 = vmax.f32 %v338_v58, %v341_v60 }
 0x205   : > { %v343_v62 = vsel %vm231_vm2, %v342_v61, 0.0 }
 0x206   : > { %v344_v63 = vrot.slane %v343_v62, 4 }
 0x208   : > { %v345_v0 = vadd.f32 %v344_v63, %v343_v62 }
 0x20a   : > { %v346_v1 = vrot.slane %v345_v0, 2 }
 0x20c   : > { %v347_v2 = vadd.f32 %v346_v1, %v345_v0 }
 0x20e   : > { %v348_v3 = vrot.slane %v347_v2, 1 }
 0x210   : > { %v349_v4 = vadd.f32 %v348_v3, %v347_v2 }
 0x212   : > { %v350_v5 = vmul.f32 0.125, %v349_v4 }
 0x214   : > { %v351_v6 = vsub.f32 %v342_v61, %v350_v5 }
 0x216   : > { %v352_v7 = vmul.f32 %v351_v6, %v351_v6 }
 0x218   : > { %v353_v8 = vsel %vm231_vm2, %v352_v7, 0.0 }
 0x219   : > { %v354_v9 = vrot.slane %v353_v8, 4 }
 0x21b   : > { %v355_v10 = vadd.f32 %v354_v9, %v353_v8 }
 0x21d   : > { %v356_v11 = vrot.slane %v355_v10, 2 }
 0x21f   : > { %v357_v12 = vadd.f32 %v356_v11, %v355_v10 }
 0x221   : > { %v358_v14 = vrot.slane %v357_v12, 1 }
 0x223   : > { %v359_v16 = vadd.f32 %v358_v14, %v357_v12 }
 0x225   : > { %v360_v17 = vmul.f32 0.125, %v359_v16 }
 0x227   : > { %v361_v18 = vadd.f32 1e-05, %v360_v17 }
 0x229   : > { %639 = vrsqrt.f32 %v361_v18 }
 0x233   : > { %v640_v21 = vpop.eup %639 }
 0x234   : > { %v363_v22 = vmul.f32 %v640_v21, %v805_v15 }
 0x236   : > { %v367_v23 = vrot.slane %v363_v22, %v366_v19 }
 0x238   : > { %v368_v25 = vmul.f32 %v367_v23, %v351_v6 }
 0x23a   : > { %v373_v26 = vadd.f32 %v372_v24, %v368_v25 }
 0x23c   : > { %578 = vmatmul.mubr.msk.f32.vlgmr.msra.gmra.mrb[2].mxu0 %vm231_vm2, %v373_v26 }
 0x30f   : > { %v447_v29 = vpop.f32.mrb[2].mxu0 }
 0x310   : > { %v448_v30 = vadd.f32 %v447_v29, %v377_v28  ;;  %v579_v31 = vpop.f32.mrb[3].mxu0 }
 0x312   : > { %451 = vst.msk [vmem:[%s134_s4] sm:$0xff] %vm231_vm2, %v448_v30 }
 0x313   : > { %654 = shalt.err (!%p651_p3)
}
 0x314   : > { %s655_s22 = scalar_lea.hbm %s844_s8, 128  ;;  %s659_s25 = scalar_lea.hbm %s889_s2, 512 }
 0x315   : > { %p656_p4 = scmp.ne.s32.totalorder %s844_s8, %s655_s22  ;;  %p660_p9 = scmp.lt.u32.totalorder %s844_s8, %s889_s2 }
 0x316   : > { %p661_p10 = scmp.lt.u32.totalorder %s659_s25, %s655_s22  ;;  %p663_p12 = scmp.lt.u32.totalorder %s655_s22, %s844_s8 }
 0x317   : > { %p657_p7 = pnand %p656_p4, %p762_p5 }
 0x318   : > { %p662_p11 = por %p661_p10, %p660_p9 }
 0x319   : > { %p658_p8 = pneg %p657_p7 }
 0x31a   : > { %p664_p13 = por %p663_p12, %p662_p11 }
 0x31c   : > { %p665_p0 = pnand %p664_p13, %p658_p8 }
 0x31e   : > { %668 = shalt.err (!%p665_p0)
}
 0x31f   : > { %595 = dma.vmem_to_hbm [thread:$0]  (%p762_p5), %s846_s5, 128, %s844_s8, %s453_s14  }
 0x320 PF: > { %p601_p1 = scmp.ge.s32.totalorder %s703_s12, 2  ;;  %s478_s28 = sand.u32 1, %s691_s9  }
 0x321   : > { %s479_s29 = scalar_lea.sflag [#allocation3], %s478_s28 }
 0x322   : > { %p598_p2 = pnand %p601_p1, %p766_p6 }
 0x324   : > { %686 = dma.done.wait (!%p598_p2), %s479_s29, 128  }
 0x325   : > { %688 = vsyncadd (!%p598_p2), %s479_s29, 4294967168  ;;  %p12_p3 = scmp.ge.s32.totalorder %s749_s15, 6   ;;  %s892_s9 = smov %s695_s10 }
 0x326   : > { %s893_s10 = smov %s699_s11  ;;  %s894_s11 = smov %s760_s18 }
 0x327   : > { %s895_s12 = smov %s749_s15  ;;  %14 = sbr.rel (!%p12_p3) target bundleno = 3 (0x3), region = 63 }
 0x32e   :  { %484 = vsyncpa [#allocation3], 1 }
 0x32f   :  { %486 = vsyncpa [#allocation3 + $0x1], 1 }

</bundles_post_ra>
